<compile_context>
chip_gen: v5e
topology: v5e:2x2
jax: 0.10.0
libtpu: 0.0.40
codegen_flags: <defaults>
</compile_context>

<pallas_src>
import jax
import jax.numpy as jnp
from jax.experimental import pallas as pl
from jax.experimental.pallas import tpu as pltpu

# ---------------- small "model" config (scaled-down bert-large head) ---------
BERT_HIDDEN = 128          # bert_hidden_size (1024 in the real module)
HEAD_HIDDEN = 256          # head_hidden_size (1024 in the real module)
NUM_OFFSETS = 3            # A, B, pronoun -> fc input is bert_hidden_size * 3
IN_DIM = BERT_HIDDEN * NUM_OFFSETS
NUM_CLASSES = 3
OUT_PAD = 128              # pad final output width to a full lane for dense stores
BN_EPS = 1e-5
WEIGHT_DTYPE = jnp.bfloat16


def _round_up(n, m):
    return ((n + m - 1) // m) * m


# ----------------------------- Pallas kernel ---------------------------------
def head_kernel(x_ref,
                w1_ref, c1_ref,
                w2_ref, c2_ref,
                w3_ref, c3_ref,
                w4_ref, c4_ref,
                o_ref):
    """Fused Head MLP with BN pre-folded into the Linears:
       Linear->ReLU (x3), Linear(->NUM_CLASSES zero-padded to OUT_PAD)."""
    # Dropout is identity in eval mode; BN affines live in the folded weights,
    # so the body is 4 bf16 MXU matmuls (f32 accumulation) + bias + 3 ReLUs.
    h = x_ref[...].astype(WEIGHT_DTYPE)
    h = jnp.dot(h, w1_ref[...], preferred_element_type=jnp.float32) + c1_ref[...]
    h = jnp.maximum(h, 0.0).astype(WEIGHT_DTYPE)
    h = jnp.dot(h, w2_ref[...], preferred_element_type=jnp.float32) + c2_ref[...]
    h = jnp.maximum(h, 0.0).astype(WEIGHT_DTYPE)
    h = jnp.dot(h, w3_ref[...], preferred_element_type=jnp.float32) + c3_ref[...]
    h = jnp.maximum(h, 0.0).astype(WEIGHT_DTYPE)
    o_ref[...] = (jnp.dot(h, w4_ref[...], preferred_element_type=jnp.float32)
                  + c4_ref[...])


def run_head(x, params, tm=128):
    """x: (B, IN_DIM) f32.  Returns (B, NUM_CLASSES) f32."""
    B = x.shape[0]
    # Batch tile: up to 128 rows per grid step, always a multiple of 8 sublanes.
    tm = min(tm, _round_up(B, 8))
    b_pad = _round_up(B, tm)
    if b_pad != B:
        x = jnp.pad(x, ((0, b_pad - B), (0, 0)))
    grid = (b_pad // tm,)

    def resident(shape):
        # Same block for every batch tile -> weights/biases stay VMEM-resident.
        return pl.BlockSpec(shape, lambda i: (0, 0))

    in_specs = [
        pl.BlockSpec((tm, IN_DIM), lambda i: (i, 0)),                # x (pipelined)
        resident((IN_DIM, HEAD_HIDDEN)),      resident((1, HEAD_HIDDEN)),
        resident((HEAD_HIDDEN, HEAD_HIDDEN)), resident((1, HEAD_HIDDEN)),
        resident((HEAD_HIDDEN, HEAD_HIDDEN)), resident((1, HEAD_HIDDEN)),
        resident((HEAD_HIDDEN, OUT_PAD)),     resident((1, OUT_PAD)),
    ]

    out = pl.pallas_call(
        head_kernel,
        out_shape=jax.ShapeDtypeStruct((b_pad, OUT_PAD), jnp.float32),
        grid=grid,
        in_specs=in_specs,
        out_specs=pl.BlockSpec((tm, OUT_PAD), lambda i: (i, 0)),
        compiler_params=pltpu.CompilerParams(
            # Batch tiles are independent -> megacore-shard on v7x (2 TCs/chip).
            dimension_semantics=("parallel",),
            # NOTE: when scaling BERT_HIDDEN/HEAD_HIDDEN back to 1024, also set
            # vmem_limit_bytes explicitly (resident bf16 weights ~10.5 MB) so
            # the v5e 16 MiB default scoped limit does not bite.
        ),
    )(x,
      params["w1"], params["c1"],
      params["w2"], params["c2"],
      params["w3"], params["c3"],
      params["w4"], params["c4"])
    return out[:B, :NUM_CLASSES]


# ----------------------------- parameter init --------------------------------
def kaiming_normal(key, fan_in, fan_out):
    # nn.init.kaiming_normal_ default: gain = sqrt(2), std = gain / sqrt(fan_in)
    std = jnp.sqrt(2.0 / fan_in)
    # stored as (in, out) so the kernel does x @ W
    return jax.random.normal(key, (fan_in, fan_out), dtype=jnp.float32) * std


def fold_bn_into_linear(gamma, beta, mean, var, w, c):
    """y = ((x-mean)/sqrt(var+eps)*gamma+beta) @ W + c  ==  x @ W' + c'."""
    scale = gamma / jnp.sqrt(var + BN_EPS)              # (in,)
    shift = beta - mean * scale                         # (in,)
    w_f = scale[:, None] * w                            # (in, out)
    c_f = shift @ w + c                                 # (out,)
    return w_f, c_f


def make_params(key):
    k1, k2, k3, k4 = jax.random.split(key, 4)

    def bn_init(dim):
        # nn.BatchNorm1d at init, eval mode: gamma=1, beta=0, mean=0, var=1
        return (jnp.ones((dim,), jnp.float32), jnp.zeros((dim,), jnp.float32),
                jnp.zeros((dim,), jnp.float32), jnp.ones((dim,), jnp.float32))

    zeros = lambda d: jnp.zeros((d,), jnp.float32)

    w1 = kaiming_normal(k1, IN_DIM, HEAD_HIDDEN)
    w2 = kaiming_normal(k2, HEAD_HIDDEN, HEAD_HIDDEN)
    w3 = kaiming_normal(k3, HEAD_HIDDEN, HEAD_HIDDEN)
    w4s = kaiming_normal(k4, HEAD_HIDDEN, NUM_CLASSES)
    # zero-pad final weight to OUT_PAD lanes -> lane-dense (unmasked) store;
    # out[:, :NUM_CLASSES] stays exact.
    w4 = jnp.zeros((HEAD_HIDDEN, OUT_PAD), jnp.float32).at[:, :NUM_CLASSES].set(w4s)

    # Fold the eval-mode BatchNorm affines into the Linear that follows them.
    w1, c1 = fold_bn_into_linear(*bn_init(IN_DIM), w1, zeros(HEAD_HIDDEN))
    w2, c2 = fold_bn_into_linear(*bn_init(HEAD_HIDDEN), w2, zeros(HEAD_HIDDEN))
    w3, c3 = fold_bn_into_linear(*bn_init(HEAD_HIDDEN), w3, zeros(HEAD_HIDDEN))
    w4, c4 = fold_bn_into_linear(*bn_init(HEAD_HIDDEN), w4, zeros(OUT_PAD))

    return dict(
        w1=w1.astype(WEIGHT_DTYPE), c1=c1.reshape(1, -1),
        w2=w2.astype(WEIGHT_DTYPE), c2=c2.reshape(1, -1),
        w3=w3.astype(WEIGHT_DTYPE), c3=c3.reshape(1, -1),
        w4=w4.astype(WEIGHT_DTYPE), c4=c4.reshape(1, -1),
    )


# ------------------------- GAPModel.forward (JAX glue) -----------------------
def gap_model_forward(token_tensor, offsets, params, embedding):
    """token_tensor: (B, S) int32, offsets: (B, 3) int32."""
    # TODO(synk): stand-in for BertModel(...) -- deterministic embedding lookup,
    # masked where token id == 0 (mirrors attention_mask = (token_tensor > 0)).
    mask = (token_tensor > 0).astype(jnp.float32)[..., None]          # (B, S, 1)
    bert_outputs = embedding[token_tensor] * mask                      # (B, S, H)

    # Head.forward gather:
    #   bert_outputs.gather(1, offsets.unsqueeze(2).expand(-1,-1,H)).view(B, -1)
    gathered = jnp.take_along_axis(
        bert_outputs, offsets[:, :, None], axis=1)                     # (B, 3, H)
    x = gathered.reshape(token_tensor.shape[0], IN_DIM)

    # Hot path: fused MLP head in Pallas.
    return run_head(x, params)


# ----------------------------------- main ------------------------------------
if __name__ == "__main__":
    key = jax.random.PRNGKey(0)
    k_params, k_emb, k_tok, k_off = jax.random.split(key, 4)

    B, S, VOCAB = 8, 16, 64

    params = make_params(k_params)
    embedding = jax.random.normal(k_emb, (VOCAB, BERT_HIDDEN), dtype=jnp.float32)

    token_tensor = jax.random.randint(k_tok, (B, S), minval=0, maxval=VOCAB,
                                      dtype=jnp.int32)
    offsets = jax.random.randint(k_off, (B, NUM_OFFSETS), minval=0, maxval=S,
                                 dtype=jnp.int32)

    out = gap_model_forward(token_tensor, offsets, params, embedding)
    out = jax.block_until_ready(out)

    assert out.shape == (B, NUM_CLASSES), out.shape
    assert jnp.all(jnp.isfinite(out))
    print("KERNEL_OK")
</pallas_src>

<mosaic_0001>
module attributes {stable_mosaic.version = 11 : i64} {
  func.func @head_kernel(%arg0: i32, %arg1: memref<8x384xf32, #tpu.memory_space<vmem>>, %arg2: memref<384x256xbf16, #tpu.memory_space<vmem>>, %arg3: memref<1x256xf32, #tpu.memory_space<vmem>>, %arg4: memref<256x256xbf16, #tpu.memory_space<vmem>>, %arg5: memref<1x256xf32, #tpu.memory_space<vmem>>, %arg6: memref<256x256xbf16, #tpu.memory_space<vmem>>, %arg7: memref<1x256xf32, #tpu.memory_space<vmem>>, %arg8: memref<256x128xbf16, #tpu.memory_space<vmem>>, %arg9: memref<1x128xf32, #tpu.memory_space<vmem>>, %arg10: memref<8x128xf32, #tpu.memory_space<vmem>>) attributes {dimension_semantics = [#tpu.dimension_semantics<parallel>], iteration_bounds = array<i64: 1>, scalar_prefetch = 0 : i64, scratch_operands = 0 : i64, tpu.core_type = #tpu.core_type<tc>, window_params = [{transform_indices = @transform_0, window_bounds = array<i64: 8, 384>}, {pipeline_mode = #tpu.pipeline_mode<synchronous>, transform_indices = @transform_1, window_bounds = array<i64: 384, 256>}, {pipeline_mode = #tpu.pipeline_mode<synchronous>, transform_indices = @transform_2, window_bounds = array<i64: 1, 256>}, {pipeline_mode = #tpu.pipeline_mode<synchronous>, transform_indices = @transform_3, window_bounds = array<i64: 256, 256>}, {pipeline_mode = #tpu.pipeline_mode<synchronous>, transform_indices = @transform_4, window_bounds = array<i64: 1, 256>}, {pipeline_mode = #tpu.pipeline_mode<synchronous>, transform_indices = @transform_5, window_bounds = array<i64: 256, 256>}, {pipeline_mode = #tpu.pipeline_mode<synchronous>, transform_indices = @transform_6, window_bounds = array<i64: 1, 256>}, {pipeline_mode = #tpu.pipeline_mode<synchronous>, transform_indices = @transform_7, window_bounds = array<i64: 256, 128>}, {pipeline_mode = #tpu.pipeline_mode<synchronous>, transform_indices = @transform_8, window_bounds = array<i64: 1, 128>}, {transform_indices = @transform_9, window_bounds = array<i64: 8, 128>}]} {
    %c0 = arith.constant 0 : index
    %c0_0 = arith.constant 0 : index
    %0 = vector.load %arg1[%c0, %c0_0] : memref<8x384xf32, #tpu.memory_space<vmem>>, vector<8x384xf32>
    %1 = arith.truncf %0 : vector<8x384xf32> to vector<8x384xbf16>
    %c0_1 = arith.constant 0 : index
    %c0_2 = arith.constant 0 : index
    %2 = vector.load %arg2[%c0_1, %c0_2] : memref<384x256xbf16, #tpu.memory_space<vmem>>, vector<384x256xbf16>
    %cst = arith.constant dense<0.000000e+00> : vector<8x256xf32>
    %3 = tpu.matmul %1, %2, %cst {dimension_numbers = #tpu.dot_dimension_numbers<[1], [0], [0], [1], [0, 0, 1, 1], [], []>} : vector<8x384xbf16>, vector<384x256xbf16>, vector<8x256xf32> -> vector<8x256xf32>
    %c0_3 = arith.constant 0 : index
    %c0_4 = arith.constant 0 : index
    %4 = vector.load %arg3[%c0_3, %c0_4] : memref<1x256xf32, #tpu.memory_space<vmem>>, vector<1x256xf32>
    %5 = vector.broadcast %4 : vector<1x256xf32> to vector<8x256xf32>
    %6 = arith.addf %3, %5 : vector<8x256xf32>
    %cst_5 = arith.constant 0.000000e+00 : f32
    %7 = vector.broadcast %cst_5 : f32 to vector<8x256xf32>
    %8 = arith.maximumf %6, %7 : vector<8x256xf32>
    %9 = arith.truncf %8 : vector<8x256xf32> to vector<8x256xbf16>
    %c0_6 = arith.constant 0 : index
    %c0_7 = arith.constant 0 : index
    %10 = vector.load %arg4[%c0_6, %c0_7] : memref<256x256xbf16, #tpu.memory_space<vmem>>, vector<256x256xbf16>
    %cst_8 = arith.constant dense<0.000000e+00> : vector<8x256xf32>
    %11 = tpu.matmul %9, %10, %cst_8 {dimension_numbers = #tpu.dot_dimension_numbers<[1], [0], [0], [1], [0, 0, 1, 1], [], []>} : vector<8x256xbf16>, vector<256x256xbf16>, vector<8x256xf32> -> vector<8x256xf32>
    %c0_9 = arith.constant 0 : index
    %c0_10 = arith.constant 0 : index
    %12 = vector.load %arg5[%c0_9, %c0_10] : memref<1x256xf32, #tpu.memory_space<vmem>>, vector<1x256xf32>
    %13 = vector.broadcast %12 : vector<1x256xf32> to vector<8x256xf32>
    %14 = arith.addf %11, %13 : vector<8x256xf32>
    %cst_11 = arith.constant 0.000000e+00 : f32
    %15 = vector.broadcast %cst_11 : f32 to vector<8x256xf32>
    %16 = arith.maximumf %14, %15 : vector<8x256xf32>
    %17 = arith.truncf %16 : vector<8x256xf32> to vector<8x256xbf16>
    %c0_12 = arith.constant 0 : index
    %c0_13 = arith.constant 0 : index
    %18 = vector.load %arg6[%c0_12, %c0_13] : memref<256x256xbf16, #tpu.memory_space<vmem>>, vector<256x256xbf16>
    %cst_14 = arith.constant dense<0.000000e+00> : vector<8x256xf32>
    %19 = tpu.matmul %17, %18, %cst_14 {dimension_numbers = #tpu.dot_dimension_numbers<[1], [0], [0], [1], [0, 0, 1, 1], [], []>} : vector<8x256xbf16>, vector<256x256xbf16>, vector<8x256xf32> -> vector<8x256xf32>
    %c0_15 = arith.constant 0 : index
    %c0_16 = arith.constant 0 : index
    %20 = vector.load %arg7[%c0_15, %c0_16] : memref<1x256xf32, #tpu.memory_space<vmem>>, vector<1x256xf32>
    %21 = vector.broadcast %20 : vector<1x256xf32> to vector<8x256xf32>
    %22 = arith.addf %19, %21 : vector<8x256xf32>
    %cst_17 = arith.constant 0.000000e+00 : f32
    %23 = vector.broadcast %cst_17 : f32 to vector<8x256xf32>
    %24 = arith.maximumf %22, %23 : vector<8x256xf32>
    %25 = arith.truncf %24 : vector<8x256xf32> to vector<8x256xbf16>
    %c0_18 = arith.constant 0 : index
    %c0_19 = arith.constant 0 : index
    %26 = vector.load %arg8[%c0_18, %c0_19] : memref<256x128xbf16, #tpu.memory_space<vmem>>, vector<256x128xbf16>
    %cst_20 = arith.constant dense<0.000000e+00> : vector<8x128xf32>
    %27 = tpu.matmul %25, %26, %cst_20 {dimension_numbers = #tpu.dot_dimension_numbers<[1], [0], [0], [1], [0, 0, 1, 1], [], []>} : vector<8x256xbf16>, vector<256x128xbf16>, vector<8x128xf32> -> vector<8x128xf32>
    %c0_21 = arith.constant 0 : index
    %c0_22 = arith.constant 0 : index
    %28 = vector.load %arg9[%c0_21, %c0_22] : memref<1x128xf32, #tpu.memory_space<vmem>>, vector<1x128xf32>
    %29 = vector.broadcast %28 : vector<1x128xf32> to vector<8x128xf32>
    %30 = arith.addf %27, %29 : vector<8x128xf32>
    %c0_23 = arith.constant 0 : index
    %c0_24 = arith.constant 0 : index
    %31 = vector.load %arg10[%c0_23, %c0_24] : memref<8x128xf32, #tpu.memory_space<vmem>>, vector<8x128xf32>
    tpu.vector_store %arg10[%c0_23, %c0_24], %30 {strides = array<i32>} : memref<8x128xf32, #tpu.memory_space<vmem>>, vector<8x128xf32>,
    return
  }
  func.func @transform_0(%arg0: i32) -> (i32, i32) {
    %c0_i32 = arith.constant 0 : i32
    %c0_i32_0 = arith.constant 0 : i32
    return %arg0, %c0_i32 : i32, i32
  }
  func.func @transform_1(%arg0: i32) -> (i32, i32) {
    %c0_i32 = arith.constant 0 : i32
    %c0_i32_0 = arith.constant 0 : i32
    %c0_i32_1 = arith.constant 0 : i32
    return %c0_i32, %c0_i32_0 : i32, i32
  }
  func.func @transform_2(%arg0: i32) -> (i32, i32) {
    %c0_i32 = arith.constant 0 : i32
    %c0_i32_0 = arith.constant 0 : i32
    %c0_i32_1 = arith.constant 0 : i32
    return %c0_i32, %c0_i32_0 : i32, i32
  }
  func.func @transform_3(%arg0: i32) -> (i32, i32) {
    %c0_i32 = arith.constant 0 : i32
    %c0_i32_0 = arith.constant 0 : i32
    %c0_i32_1 = arith.constant 0 : i32
    return %c0_i32, %c0_i32_0 : i32, i32
  }
  func.func @transform_4(%arg0: i32) -> (i32, i32) {
    %c0_i32 = arith.constant 0 : i32
    %c0_i32_0 = arith.constant 0 : i32
    %c0_i32_1 = arith.constant 0 : i32
    return %c0_i32, %c0_i32_0 : i32, i32
  }
  func.func @transform_5(%arg0: i32) -> (i32, i32) {
    %c0_i32 = arith.constant 0 : i32
    %c0_i32_0 = arith.constant 0 : i32
    %c0_i32_1 = arith.constant 0 : i32
    return %c0_i32, %c0_i32_0 : i32, i32
  }
  func.func @transform_6(%arg0: i32) -> (i32, i32) {
    %c0_i32 = arith.constant 0 : i32
    %c0_i32_0 = arith.constant 0 : i32
    %c0_i32_1 = arith.constant 0 : i32
    return %c0_i32, %c0_i32_0 : i32, i32
  }
  func.func @transform_7(%arg0: i32) -> (i32, i32) {
    %c0_i32 = arith.constant 0 : i32
    %c0_i32_0 = arith.constant 0 : i32
    %c0_i32_1 = arith.constant 0 : i32
    return %c0_i32, %c0_i32_0 : i32, i32
  }
  func.func @transform_8(%arg0: i32) -> (i32, i32) {
    %c0_i32 = arith.constant 0 : i32
    %c0_i32_0 = arith.constant 0 : i32
    %c0_i32_1 = arith.constant 0 : i32
    return %c0_i32, %c0_i32_0 : i32, i32
  }
  func.func @transform_9(%arg0: i32) -> (i32, i32) {
    %c0_i32 = arith.constant 0 : i32
    %c0_i32_0 = arith.constant 0 : i32
    return %arg0, %c0_i32 : i32, i32
  }
}

</mosaic_0001>

<bundles_post_ra>
// kernel: tpu_custom_call.1
= control target key start
LH: loop header
LB: loop body
LE: loop exit
PB: predicated region body
PF: predicated region fallthrough
CT: control target
= control target key end

     0   :  { %14 = vsyncpa [#allocation3], 0  ;;  %s2130_s0 = inlined_call_operand.hbm [shape: f32[8,384], index: 0, kind: input, shape index: {}]   ;;  %s2131_s1 = inlined_call_operand.hbm [shape: bf16[384,256], index: 1, kind: input, shape index: {}]   ;;  %s2132_s2 = inlined_call_operand.hbm [shape: f32[1,256], index: 2, kind: input, shape index: {}]   ;;  %s2133_s3 = inlined_call_operand.hbm [shape: bf16[256,256], index: 3, kind: input, shape index: {}]   ;;  %s2134_s4 = inlined_call_operand.vmem [shape: f32[1,256], index: 4, kind: input, shape index: {}]   ;;  %s2135_s5 = inlined_call_operand.hbm [shape: bf16[256,256], index: 5, kind: input, shape index: {}]   ;;  %s2136_s6 = inlined_call_operand.vmem [shape: f32[1,256], index: 6, kind: input, shape index: {}]   ;;  %s2137_s7 = inlined_call_operand.hbm [shape: bf16[256,128], index: 7, kind: input, shape index: {}]   ;;  %s2138_s8 = inlined_call_operand.vmem [shape: f32[1,128], index: 8, kind: input, shape index: {}]   ;;  %s2139_s9 = inlined_call_operand.hbm [shape: f32[8,128], index: 9, kind: output, shape index: {}]  }
   0x1   :  { %15 = vsyncpa [#allocation6], 0 }
   0x2   :  { %16 = vsyncpa [#allocation9], 0 }
   0x3   :  { %17 = vsyncpa [#allocation12], 0  ;;  %s34_s11 = sshll.u32 %s2131_s1, 4  ;;  %s35_s11 = int_to_ptr.hbm [resolvable:$true] %s34_s11 }
   0x4   :  { %18 = vsyncpa [#allocation4], 0  ;;  %s2022_s12 = smov [#allocation5]   ;;  %s58_s16 = sshll.u32 %s2133_s3, 4  ;;  %s59_s16 = int_to_ptr.hbm [resolvable:$true] %s58_s16 }
   0x5   :  { %s36_s13 = sshll.u32 %s2022_s12, 4  ;;  %s2023_s17 = smov 128   ;;  %s37_s13 = int_to_ptr.vmem [resolvable:$true] %s36_s13 }
   0x6   :  { %s2024_s18 = smov 8   ;;  %s2025_s19 = smov [#allocation8]  }
   0x7   :  { %42 = dma.hbm_to_vmem [thread:$0]  %s35_s11, 6144, %s37_s13, [#allocation6], %s2023_s17, %s2023_s17, %s2024_s18  }
   0x8   :  { %s60_s20 = sshll.u32 %s2025_s19, 4  ;;  %s24_s22 = sshll.u32 %s2130_s0, 4  ;;  %s61_s20 = int_to_ptr.vmem [resolvable:$true] %s60_s20  ;;  %s25_s22 = int_to_ptr.hbm [resolvable:$true] %s24_s22 }
   0x9   :  { %66 = dma.hbm_to_vmem [thread:$0]  %s59_s16, 4096, %s61_s20, [#allocation9], %s2023_s17, %s2023_s17, %s2024_s18  }
   0xa   :  { %s48_s24 = sshll.u32 %s2132_s2, 4  ;;  %s2026_s25 = smov [#allocation2]   ;;  %s49_s24 = int_to_ptr.hbm [resolvable:$true] %s48_s24 }
   0xb   :  { %s26_s26 = sshll.u32 %s2026_s25, 4  ;;  %s2027_s27 = smov [#allocation7]   ;;  %s27_s26 = int_to_ptr.vmem [resolvable:$true] %s26_s26 }
   0xc   :  { %29 = dma.hbm_to_vmem [thread:$0]  %s25_s22, 384, %s27_s26, [#allocation3]  }
   0xd   :  { %s50_s28 = sshll.u32 %s2027_s27, 4  ;;  %s73_s0 = sshll.u32 %s2135_s5, 4  ;;  %s51_s28 = int_to_ptr.vmem [resolvable:$true] %s50_s28  ;;  %s74_s0 = int_to_ptr.hbm [resolvable:$true] %s73_s0 }
   0xe   :  { %53 = dma.hbm_to_vmem [thread:$0]  %s49_s24, 32, %s51_s28, [#allocation6]  }
   0xf   :  { %s88_s12 = sshll.u32 %s2137_s7, 4  ;;  %s2028_s13 = smov [#allocation10]   ;;  %s89_s12 = int_to_ptr.hbm [resolvable:$true] %s88_s12 }
  0x10   :  { %s75_s2 = sshll.u32 %s2028_s13, 4  ;;  %s2029_s14 = smov [#allocation11]   ;;  %s76_s2 = int_to_ptr.vmem [resolvable:$true] %s75_s2 }
  0x11   :  { %81 = dma.hbm_to_vmem [thread:$0]  %s74_s0, 4096, %s76_s2, [#allocation9], %s2023_s17, %s2023_s17, %s2024_s18  }
  0x12   :  { %s90_s15 = sshll.u32 %s2029_s14, 4  ;;  %s2030_s16 = smov 64   ;;  %s91_s15 = int_to_ptr.vmem [resolvable:$true] %s90_s15 }
  0x13   :  { %s2031_s5 = smov 4  }
  0x14   :  { %96 = dma.hbm_to_vmem [thread:$0]  %s89_s12, 2048, %s91_s15, [#allocation12], %s2030_s16, %s2030_s16, %s2031_s5  }
  0x15   :  { %2012 = dma.done.wait [#allocation3], 384  }
  0x16   :  { %2013 = vsyncadd [#allocation3], 4294966912 }
  0x17   :  { %2014 = dma.done.wait [#allocation6], 6176  }
  0x18   :  { %2015 = vsyncadd [#allocation6], 4294961120 }
  0x19   :  { %2016 = dma.done.wait [#allocation9], 8192  }
  0x1a   :  { %2017 = vsyncadd [#allocation9], 4294959104 }
  0x1b   :  { %2018 = dma.done.wait [#allocation12], 2048  }
  0x1c   :  { %2019 = vsyncadd [#allocation12], 4294965248  ;;  %v1250_v0 = vld [vmem:[#allocation5 + $0x70] sm:$0xf]  ;;  %v1719_v1 = vld [vmem:[#allocation5 + $0x74] sm:$0xf0] }
  0x1d   :  { %v1314_v2 = vld [vmem:[#allocation5 + $0xf0] sm:$0xf]  ;;  %v1251_v3 = vor.u32 %v1719_v1, %v1250_v0  ;;  %v1735_v4 = vld [vmem:[#allocation5 + $0xf4] sm:$0xf0]  ;;  %v1242_v9 = vld [vmem:[#allocation5 + $0x60] sm:$0xf] }
  0x1e   :  { %v1378_v5 = vld [vmem:[#allocation5 + $0x170] sm:$0xf]  ;;  %v1751_v6 = vld [vmem:[#allocation5 + $0x174] sm:$0xf0]  ;;  %v1315_v7 = vor.u32 %v1735_v4, %v1314_v2  ;;  %v1717_v10 = vld [vmem:[#allocation5 + $0x64] sm:$0xf0] }
  0x1f   :  { %v1379_v8 = vor.u32 %v1751_v6, %v1378_v5  ;;  %v1306_v11 = vld [vmem:[#allocation5 + $0xe0] sm:$0xf]  ;;  %423 = vmatpush.bf16.msra.mxu0 %v1251_v3  ;;  %v1243_v12 = vor.u32 %v1717_v10, %v1242_v9  ;;  %v1733_v13 = vld [vmem:[#allocation5 + $0xe4] sm:$0xf0]  ;;  %v1234_v18 = vld [vmem:[#allocation5 + $0x50] sm:$0xf] }
  0x20   :  { %v1370_v14 = vld [vmem:[#allocation5 + $0x160] sm:$0xf]  ;;  %v1749_v15 = vld [vmem:[#allocation5 + $0x164] sm:$0xf0]  ;;  %436 = vmatpush.bf16.msra.mxu1 %v1315_v7  ;;  %v1307_v16 = vor.u32 %v1733_v13, %v1306_v11  ;;  %v1715_v19 = vld [vmem:[#allocation5 + $0x54] sm:$0xf0] }
  0x21   :  { %449 = vmatpush.bf16.msra.mxu2 %v1379_v8  ;;  %v1371_v17 = vor.u32 %v1749_v15, %v1370_v14  ;;  %v1298_v20 = vld [vmem:[#allocation5 + $0xd0] sm:$0xf]  ;;  %v1731_v21 = vld [vmem:[#allocation5 + $0xd4] sm:$0xf0]  ;;  %v1235_v24 = vor.u32 %v1715_v19, %v1234_v18  ;;  %v1718_v25 = vld [vmem:[#allocation5 + $0x74] sm:$0xf] }
  0x22   :  { %v1362_v22 = vld [vmem:[#allocation5 + $0x150] sm:$0xf]  ;;  %v1747_v23 = vld [vmem:[#allocation5 + $0x154] sm:$0xf0]  ;;  %v1252_v26 = vld [vmem:[#allocation5 + $0x78] sm:$0xf0]  ;;  %v1299_v27 = vor.u32 %v1731_v21, %v1298_v20 }
  0x23   :  { %424 = vmatpush.bf16.msra.mxu0 %v1243_v12  ;;  %v1363_v28 = vor.u32 %v1747_v23, %v1362_v22  ;;  %v1226_v29 = vld [vmem:[#allocation5 + $0x40] sm:$0xf]  ;;  %v1713_v30 = vld [vmem:[#allocation5 + $0x44] sm:$0xf0]  ;;  %v1255_v32 = vor.u32 %v1718_v25, %v1252_v26  ;;  %v1716_v36 = vld [vmem:[#allocation5 + $0x64] sm:$0xf] }
  0x24   :  { %437 = vmatpush.bf16.msra.mxu1 %v1307_v16  ;;  %v1290_v31 = vld [vmem:[#allocation5 + $0xc0] sm:$0xf]  ;;  %v1729_v33 = vld [vmem:[#allocation5 + $0xc4] sm:$0xf0]  ;;  %v1244_v37 = vld [vmem:[#allocation5 + $0x68] sm:$0xf0]  ;;  %v1227_v38 = vor.u32 %v1713_v30, %v1226_v29 }
  0x25   :  { %450 = vmatpush.bf16.msra.mxu2 %v1371_v17  ;;  %v1354_v34 = vld [vmem:[#allocation5 + $0x140] sm:$0xf]  ;;  %v1745_v35 = vld [vmem:[#allocation5 + $0x144] sm:$0xf0]  ;;  %462 = vmatpush.bf16.msra.mxu3 %v1255_v32  ;;  %v1218_v39 = vld [vmem:[#allocation5 + $0x30] sm:$0xf]  ;;  %v1247_v41 = vor.u32 %v1716_v36, %v1244_v37  ;;  %v1291_v42 = vor.u32 %v1729_v33, %v1290_v31 }
  0x26   :  { %v1711_v40 = vld [vmem:[#allocation5 + $0x34] sm:$0xf0]  ;;  %v1355_v43 = vor.u32 %v1745_v35, %v1354_v34  ;;  %v1282_v44 = vld [vmem:[#allocation5 + $0xb0] sm:$0xf]  ;;  %v1714_v46 = vld [vmem:[#allocation5 + $0x54] sm:$0xf] }
  0x27   :  { %425 = vmatpush.bf16.msra.mxu0 %v1235_v24  ;;  %v1727_v45 = vld [vmem:[#allocation5 + $0xb4] sm:$0xf0]  ;;  %v1346_v47 = vld [vmem:[#allocation5 + $0x130] sm:$0xf]  ;;  %v1236_v49 = vld [vmem:[#allocation5 + $0x58] sm:$0xf0]  ;;  %v1219_v51 = vor.u32 %v1711_v40, %v1218_v39 }
  0x28   :  { %438 = vmatpush.bf16.msra.mxu1 %v1299_v27  ;;  %v1743_v48 = vld [vmem:[#allocation5 + $0x134] sm:$0xf0]  ;;  %v1239_v50 = vor.u32 %v1714_v46, %v1236_v49  ;;  %v1712_v52 = vld [vmem:[#allocation5 + $0x44] sm:$0xf]  ;;  %v1228_v53 = vld [vmem:[#allocation5 + $0x48] sm:$0xf0]  ;;  %v1283_v54 = vor.u32 %v1727_v45, %v1282_v44 }
  0x29   :  { %451 = vmatpush.bf16.msra.mxu2 %v1363_v28  ;;  %463 = vmatpush.bf16.msra.mxu3 %v1247_v41  ;;  %v1347_v55 = vor.u32 %v1743_v48, %v1346_v47  ;;  %v1210_v56 = vld [vmem:[#allocation5 + $0x20] sm:$0xf]  ;;  %v1709_v57 = vld [vmem:[#allocation5 + $0x24] sm:$0xf0]  ;;  %v1231_v62 = vor.u32 %v1712_v52, %v1228_v53  ;;  %v1710_v0 = vld [vmem:[#allocation5 + $0x34] sm:$0xf] }
  0x2a   :  { %v1274_v58 = vld [vmem:[#allocation5 + $0xa0] sm:$0xf]  ;;  %v1725_v59 = vld [vmem:[#allocation5 + $0xa4] sm:$0xf0]  ;;  %v1211_v63 = vor.u32 %v1709_v57, %v1210_v56  ;;  %v1220_v1 = vld [vmem:[#allocation5 + $0x38] sm:$0xf0] }
  0x2b   :  { %426 = vmatpush.bf16.msra.mxu0 %v1227_v38  ;;  %v1338_v60 = vld [vmem:[#allocation5 + $0x120] sm:$0xf]  ;;  %v1741_v61 = vld [vmem:[#allocation5 + $0x124] sm:$0xf0]  ;;  %v1275_v2 = vor.u32 %v1725_v59, %v1274_v58  ;;  %v1202_v4 = vld [vmem:[#allocation5 + $0x10] sm:$0xf]  ;;  %v1223_v10 = vor.u32 %v1710_v0, %v1220_v1 }
  0x2c   :  { %439 = vmatpush.bf16.msra.mxu1 %v1291_v42  ;;  %v1339_v3 = vor.u32 %v1741_v61, %v1338_v60  ;;  %v1707_v5 = vld [vmem:[#allocation5 + $0x14] sm:$0xf0]  ;;  %v1266_v6 = vld [vmem:[#allocation5 + $0x90] sm:$0xf]  ;;  %v1194_v12 = vld [vmem:[#allocation5] sm:$0xf] }
  0x2d   :  { %452 = vmatpush.bf16.msra.mxu2 %v1355_v43  ;;  %464 = vmatpush.bf16.msra.mxu3 %v1239_v50  ;;  %v1723_v7 = vld [vmem:[#allocation5 + $0x94] sm:$0xf0]  ;;  %v1330_v8 = vld [vmem:[#allocation5 + $0x110] sm:$0xf]  ;;  %v1203_v11 = vor.u32 %v1707_v5, %v1202_v4  ;;  %v1708_v13 = vld [vmem:[#allocation5 + $0x24] sm:$0xf] }
  0x2e   :  { %v1739_v9 = vld [vmem:[#allocation5 + $0x114] sm:$0xf0]  ;;  %v1212_v14 = vld [vmem:[#allocation5 + $0x28] sm:$0xf0]  ;;  %v1267_v15 = vor.u32 %v1723_v7, %v1266_v6  ;;  %v1705_v17 = vld [vmem:[#allocation5 + $0x4] sm:$0xf0] }
  0x2f   :  { %427 = vmatpush.bf16.msra.mxu0 %v1219_v51  ;;  %v1331_v16 = vor.u32 %v1739_v9, %v1330_v8  ;;  %v1258_v18 = vld [vmem:[#allocation5 + $0x80] sm:$0xf]  ;;  %v1721_v19 = vld [vmem:[#allocation5 + $0x84] sm:$0xf0]  ;;  %v1734_v20 = vld [vmem:[#allocation5 + $0xf4] sm:$0xf]  ;;  %v1215_v26 = vor.u32 %v1708_v13, %v1212_v14  ;;  %v1195_v27 = vor.u32 %v1705_v17, %v1194_v12 }
  0x30   :  { %440 = vmatpush.bf16.msra.mxu1 %v1283_v54  ;;  %v1316_v21 = vld [vmem:[#allocation5 + $0xf8] sm:$0xf0]  ;;  %v1750_v22 = vld [vmem:[#allocation5 + $0x174] sm:$0xf]  ;;  %v1322_v24 = vld [vmem:[#allocation5 + $0x100] sm:$0xf]  ;;  %v1259_v31 = vor.u32 %v1721_v19, %v1258_v18 }
  0x31   :  { %453 = vmatpush.bf16.msra.mxu2 %v1347_v55  ;;  %465 = vmatpush.bf16.msra.mxu3 %v1231_v62  ;;  %v1380_v23 = vld [vmem:[#allocation5 + $0x178] sm:$0xf0]  ;;  %v1737_v25 = vld [vmem:[#allocation5 + $0x104] sm:$0xf0]  ;;  %v1706_v29 = vld [vmem:[#allocation5 + $0x14] sm:$0xf]  ;;  %v1319_v32 = vor.u32 %v1734_v20, %v1316_v21 }
  0x32   :  { %v123_v28 = vld [vmem:[#allocation2] sm:$0xff]  ;;  %v1204_v30 = vld [vmem:[#allocation5 + $0x18] sm:$0xf0]  ;;  %v124_v33 = vld [vmem:[#allocation2 + $0x8] sm:$0xff]  ;;  %v1383_v34 = vor.u32 %v1750_v22, %v1380_v23  ;;  %v1323_v35 = vor.u32 %v1737_v25, %v1322_v24  ;;  %s2032_s20 = smov [#allocation13]   ;;  %s1179_s3 = sshll.u32 %s2139_s9, 4  ;;  %s1180_s3 = int_to_ptr.hbm [resolvable:$true] %s1179_s3 }
  0x33   :  { %428 = vmatpush.bf16.msra.mxu0 %v1211_v63  ;;  %v1732_v36 = vld [vmem:[#allocation5 + $0xe4] sm:$0xf]  ;;  %v1308_v37 = vld [vmem:[#allocation5 + $0xe8] sm:$0xf0]  ;;  %v125_v38 = vld [vmem:[#allocation2 + $0x10] sm:$0xff]  ;;  %v126_v41 = vpack.c.bf16 %v123_v28, %v123_v28  ;;  %v1207_v42 = vor.u32 %v1706_v29, %v1204_v30  ;;  %v2110_v43 = vpack.c.bf16 %v124_v33, %v124_v33  ;;  %s1177_s21 = sshll.u32 %s2032_s20, 4  ;;  %s1178_s21 = int_to_ptr.vmem [resolvable:$true] %s1177_s21 }
  0x34   :  { %441 = vmatpush.bf16.msra.mxu1 %v1275_v2  ;;  %v1748_v39 = vld [vmem:[#allocation5 + $0x164] sm:$0xf]  ;;  %v1372_v40 = vld [vmem:[#allocation5 + $0x168] sm:$0xf0]  ;;  %v1311_v46 = vor.u32 %v1732_v36, %v1308_v37  ;;  %v2112_v47 = vpack.c.bf16 %v125_v38, %v125_v38  ;;  %v1730_v48 = vld [vmem:[#allocation5 + $0xd4] sm:$0xf] }
  0x35   :  { %454 = vmatpush.bf16.msra.mxu2 %v1339_v3  ;;  %466 = vmatpush.bf16.msra.mxu3 %v1223_v10  ;;  %v1704_v44 = vld [vmem:[#allocation5 + $0x4] sm:$0xf]  ;;  %v1196_v45 = vld [vmem:[#allocation5 + $0x8] sm:$0xf0]  ;;  %v1375_v49 = vor.u32 %v1748_v39, %v1372_v40  ;;  %v1300_v50 = vld [vmem:[#allocation5 + $0xd8] sm:$0xf0] }
  0x36   :  { %v1442_v51 = vld [vmem:[#allocation8 + $0x70] sm:$0xf]  ;;  %v1767_v52 = vld [vmem:[#allocation8 + $0x74] sm:$0xf0]  ;;  %v1199_v55 = vor.u32 %v1704_v44, %v1196_v45  ;;  %v1434_v57 = vld [vmem:[#allocation8 + $0x60] sm:$0xf]  ;;  %v1303_v59 = vor.u32 %v1730_v48, %v1300_v50 }
  0x37   :  { %429 = vmatpush.bf16.msra.mxu0 %v1203_v11  ;;  %v1746_v53 = vld [vmem:[#allocation5 + $0x154] sm:$0xf]  ;;  %v1364_v54 = vld [vmem:[#allocation5 + $0x158] sm:$0xf0]  ;;  %v1443_v56 = vor.u32 %v1767_v52, %v1442_v51  ;;  %v1765_v58 = vld [vmem:[#allocation8 + $0x64] sm:$0xf0] }
  0x38   :  { %442 = vmatpush.bf16.msra.mxu1 %v1267_v15  ;;  %v1367_v60 = vor.u32 %v1746_v53, %v1364_v54  ;;  %v1728_v61 = vld [vmem:[#allocation5 + $0xc4] sm:$0xf]  ;;  %v1292_v62 = vld [vmem:[#allocation5 + $0xc8] sm:$0xf0]  ;;  %v1435_v1 = vor.u32 %v1765_v58, %v1434_v57  ;;  %v1426_v2 = vld [vmem:[#allocation8 + $0x50] sm:$0xf] }
  0x39   :  { %455 = vmatpush.bf16.msra.mxu2 %v1331_v16  ;;  %467 = vmatpush.bf16.msra.mxu3 %v1215_v26  ;;  %v1744_v63 = vld [vmem:[#allocation5 + $0x144] sm:$0xf]  ;;  %v1356_v0 = vld [vmem:[#allocation5 + $0x148] sm:$0xf0]  ;;  %v1763_v3 = vld [vmem:[#allocation8 + $0x54] sm:$0xf0]  ;;  %v1295_v4 = vor.u32 %v1728_v61, %v1292_v62 }
  0x3a   :  { %v1359_v5 = vor.u32 %v1744_v63, %v1356_v0  ;;  %v1726_v6 = vld [vmem:[#allocation5 + $0xb4] sm:$0xf]  ;;  %v1284_v7 = vld [vmem:[#allocation5 + $0xb8] sm:$0xf0]  ;;  %v1427_v10 = vor.u32 %v1763_v3, %v1426_v2  ;;  %v1418_v11 = vld [vmem:[#allocation8 + $0x40] sm:$0xf] }
  0x3b   :  { %430 = vmatpush.bf16.msra.mxu0 %v1195_v27  ;;  %v1742_v8 = vld [vmem:[#allocation5 + $0x134] sm:$0xf]  ;;  %v1348_v9 = vld [vmem:[#allocation5 + $0x138] sm:$0xf0]  ;;  %v1761_v12 = vld [vmem:[#allocation8 + $0x44] sm:$0xf0]  ;;  %v1287_v13 = vor.u32 %v1726_v6, %v1284_v7 }
  0x3c   :  { %443 = vmatpush.bf16.msra.mxu1 %v1259_v31  ;;  %v1351_v14 = vor.u32 %v1742_v8, %v1348_v9  ;;  %v1724_v15 = vld [vmem:[#allocation5 + $0xa4] sm:$0xf]  ;;  %v1276_v16 = vld [vmem:[#allocation5 + $0xa8] sm:$0xf0]  ;;  %v1419_v19 = vor.u32 %v1761_v12, %v1418_v11  ;;  %v1410_v20 = vld [vmem:[#allocation8 + $0x30] sm:$0xf] }
  0x3d   :  { %456 = vmatpush.bf16.msra.mxu2 %v1323_v35  ;;  %468 = vmatpush.bf16.msra.mxu3 %v1207_v42  ;;  %v1740_v17 = vld [vmem:[#allocation5 + $0x124] sm:$0xf]  ;;  %v1340_v18 = vld [vmem:[#allocation5 + $0x128] sm:$0xf0]  ;;  %v1759_v21 = vld [vmem:[#allocation8 + $0x34] sm:$0xf0]  ;;  %v1279_v22 = vor.u32 %v1724_v15, %v1276_v16 }
  0x3e   :  { %431 = vmatmul.bf16.vlgmr.msra.gmra.mxu0 %v126_v41  ;;  %v1343_v23 = vor.u32 %v1740_v17, %v1340_v18  ;;  %v1722_v24 = vld [vmem:[#allocation5 + $0x94] sm:$0xf]  ;;  %v1268_v25 = vld [vmem:[#allocation5 + $0x98] sm:$0xf0]  ;;  %v1411_v28 = vor.u32 %v1759_v21, %v1410_v20  ;;  %v1720_v31 = vld [vmem:[#allocation5 + $0x84] sm:$0xf] }
  0x3f   :  { %475 = vmatpush.bf16.msrb.mxu0 %v1319_v32  ;;  %444 = vmatmul.bf16.vlgmr.msra.gmra.mxu1 %v2110_v43  ;;  %v1738_v26 = vld [vmem:[#allocation5 + $0x114] sm:$0xf]  ;;  %v1332_v27 = vld [vmem:[#allocation5 + $0x118] sm:$0xf0]  ;;  %v1271_v29 = vor.u32 %v1722_v24, %v1268_v25  ;;  %v1260_v32 = vld [vmem:[#allocation5 + $0x88] sm:$0xf0] }
  0x40   :  { %488 = vmatpush.bf16.msrb.mxu1 %v1383_v34  ;;  %457 = vmatmul.bf16.vlgmr.msra.gmra.mxu2 %v2112_v47  ;;  %v1335_v30 = vor.u32 %v1738_v26, %v1332_v27  ;;  %v1736_v33 = vld [vmem:[#allocation5 + $0x104] sm:$0xf]  ;;  %v1324_v34 = vld [vmem:[#allocation5 + $0x108] sm:$0xf0]  ;;  %v1766_v35 = vld [vmem:[#allocation8 + $0x74] sm:$0xf]  ;;  %v1263_v37 = vor.u32 %v1720_v31, %v1260_v32 }
  0x41   :  { %703 = vmatpush.bf16.msrb.mxu2 %v1443_v56  ;;  %469 = vmatpush.bf16.msra.mxu3 %v1199_v55  ;;  %v1444_v36 = vld [vmem:[#allocation8 + $0x78] sm:$0xf0]  ;;  %v1327_v38 = vor.u32 %v1736_v33, %v1324_v34  ;;  %v1764_v40 = vld [vmem:[#allocation8 + $0x64] sm:$0xf]  ;;  %v1762_v44 = vld [vmem:[#allocation8 + $0x54] sm:$0xf] }
  0x42   :  { %v1447_v39 = vor.u32 %v1766_v35, %v1444_v36  ;;  %v1428_v45 = vld [vmem:[#allocation8 + $0x58] sm:$0xf0]  ;;  %v1760_v48 = vld [vmem:[#allocation8 + $0x44] sm:$0xf]  ;;  %v1758_v51 = vld [vmem:[#allocation8 + $0x34] sm:$0xf] }
  0x43   :  { %476 = vmatpush.bf16.msrb.mxu0 %v1311_v46  ;;  %v1431_v46 = vor.u32 %v1762_v44, %v1428_v45  ;;  %v1412_v52 = vld [vmem:[#allocation8 + $0x38] sm:$0xf0]  ;;  %v1402_v54 = vld [vmem:[#allocation8 + $0x20] sm:$0xf]  ;;  %v1757_v55 = vld [vmem:[#allocation8 + $0x24] sm:$0xf0] }
  0x44   :  { %489 = vmatpush.bf16.msrb.mxu1 %v1375_v49  ;;  %470 = vmatmul.bf16.vlgmr.msra.gmra.mxu3 %v126_v41  ;;  %v1436_v41 = vld [vmem:[#allocation8 + $0x68] sm:$0xf0]  ;;  %v1415_v53 = vor.u32 %v1758_v51, %v1412_v52  ;;  %v1756_v56 = vld [vmem:[#allocation8 + $0x24] sm:$0xf]  ;;  %v1403_v57 = vor.u32 %v1757_v55, %v1402_v54  ;;  %v1508_v62 = vld [vmem:[#allocation8 + $0xf8] sm:$0xf0] }
  0x45   :  { %704 = vmatpush.bf16.msrb.mxu2 %v1435_v1  ;;  %v1439_v42 = vor.u32 %v1764_v40, %v1436_v41  ;;  %v1420_v49 = vld [vmem:[#allocation8 + $0x48] sm:$0xf0]  ;;  %v1394_v0 = vld [vmem:[#allocation8 + $0x10] sm:$0xf]  ;;  %v1755_v1 = vld [vmem:[#allocation8 + $0x14] sm:$0xf0] }
  0x46   :  { %v1423_v50 = vor.u32 %v1760_v48, %v1420_v49  ;;  %v1404_v58 = vld [vmem:[#allocation8 + $0x28] sm:$0xf0]  ;;  %v1754_v2 = vld [vmem:[#allocation8 + $0x14] sm:$0xf]  ;;  %v1395_v3 = vor.u32 %v1755_v1, %v1394_v0  ;;  %v1498_v6 = vld [vmem:[#allocation8 + $0xe0] sm:$0xf] }
  0x47   :  { %477 = vmatpush.bf16.msrb.mxu0 %v1303_v59  ;;  %v1407_v59 = vor.u32 %v1756_v56, %v1404_v58  ;;  %v1781_v7 = vld [vmem:[#allocation8 + $0xe4] sm:$0xf0]  ;;  %v1780_v8 = vld [vmem:[#allocation8 + $0xe4] sm:$0xf]  ;;  %v1386_v12 = vld [vmem:[#allocation8] sm:$0xf] }
  0x48   :  { %490 = vmatpush.bf16.msrb.mxu1 %v1367_v60  ;;  %v1783_v60 = vld [vmem:[#allocation8 + $0xf4] sm:$0xf0]  ;;  %v1499_v9 = vor.u32 %v1781_v7, %v1498_v6  ;;  %v1388_v16 = vld [vmem:[#allocation8 + $0x8] sm:$0xf0]  ;;  %v1490_v18 = vld [vmem:[#allocation8 + $0xd0] sm:$0xf] }
  0x49   :  { %705 = vmatpush.bf16.msrb.mxu2 %v1427_v10  ;;  %v1500_v10 = vld [vmem:[#allocation8 + $0xe8] sm:$0xf0]  ;;  %v1778_v20 = vld [vmem:[#allocation8 + $0xd4] sm:$0xf]  ;;  %v1482_v24 = vld [vmem:[#allocation8 + $0xc0] sm:$0xf] }
  0x4a   :  { %v1503_v11 = vor.u32 %v1780_v8, %v1500_v10  ;;  %v1777_v25 = vld [vmem:[#allocation8 + $0xc4] sm:$0xf0]  ;;  %v1776_v27 = vld [vmem:[#allocation8 + $0xc4] sm:$0xf]  ;;  %v1775_v31 = vld [vmem:[#allocation8 + $0xb4] sm:$0xf0] }
  0x4b   :  { %478 = vmatpush.bf16.msrb.mxu0 %v1295_v4  ;;  %v1396_v4 = vld [vmem:[#allocation8 + $0x18] sm:$0xf0]  ;;  %v1483_v26 = vor.u32 %v1777_v25, %v1482_v24  ;;  %v1774_v32 = vld [vmem:[#allocation8 + $0xb4] sm:$0xf]  ;;  %v1466_v36 = vld [vmem:[#allocation8 + $0xa0] sm:$0xf] }
  0x4c   :  { %491 = vmatpush.bf16.msrb.mxu1 %v1359_v5  ;;  %v1399_v5 = vor.u32 %v1754_v2, %v1396_v4  ;;  %v1476_v33 = vld [vmem:[#allocation8 + $0xb8] sm:$0xf0]  ;;  %v1458_v45 = vld [vmem:[#allocation8 + $0x90] sm:$0xf]  ;;  %v1770_v48 = vld [vmem:[#allocation8 + $0x94] sm:$0xf] }
  0x4d   :  { %706 = vmatpush.bf16.msrb.mxu2 %v1419_v19  ;;  %v1779_v19 = vld [vmem:[#allocation8 + $0xd4] sm:$0xf0]  ;;  %v1479_v35 = vor.u32 %v1774_v32, %v1476_v33  ;;  %v177_v41 = vld [vmem:[#allocation7] sm:$0x3]  ;;  %v1450_v55 = vld [vmem:[#allocation8 + $0x80] sm:$0xf] }
  0x4e   :  { %v1491_v21 = vor.u32 %v1779_v19, %v1490_v18  ;;  %v179_v44 = vperm.slane %v177_v41, 0  ;;  %v1769_v56 = vld [vmem:[#allocation8 + $0x84] sm:$0xf0]  ;;  %v1636_v0 = vld [vmem:[#allocation10 + $0xf8] sm:$0xf0] }
  0x4f   :  { %479 = vmatpush.bf16.msrb.mxu0 %v1287_v13  ;;  %v1753_v13 = vld [vmem:[#allocation8 + $0x4] sm:$0xf0]  ;;  %v1451_v58 = vor.u32 %v1769_v56, %v1450_v55  ;;  %v1628_v25 = vld [vmem:[#allocation10 + $0xe8] sm:$0xf0]  ;;  %v1618_v33 = vld [vmem:[#allocation10 + $0xd0] sm:$0xf] }
  0x50   :  { %492 = vmatpush.bf16.msrb.mxu1 %v1351_v14  ;;  %v1752_v14 = vld [vmem:[#allocation8 + $0x4] sm:$0xf]  ;;  %v1387_v15 = vor.u32 %v1753_v13, %v1386_v12  ;;  %v1794_v55 = vld [vmem:[#allocation10 + $0x54] sm:$0xf]  ;;  %v1556_v56 = vld [vmem:[#allocation10 + $0x58] sm:$0xf0] }
  0x51   :  { %707 = vmatpush.bf16.msrb.mxu2 %v1411_v28  ;;  %v1391_v17 = vor.u32 %v1752_v14, %v1388_v16  ;;  %v1484_v28 = vld [vmem:[#allocation8 + $0xc8] sm:$0xf0] }
  0x53   :  { %480 = vmatpush.bf16.msrb.mxu0 %v1279_v22  ;;  %v1492_v22 = vld [vmem:[#allocation8 + $0xd8] sm:$0xf0] }
  0x54   :  { %493 = vmatpush.bf16.msrb.mxu1 %v1343_v23  ;;  %v1495_v23 = vor.u32 %v1778_v20, %v1492_v22  ;;  %v1813_v22 = vld [vmem:[#allocation10 + $0xe4] sm:$0xf0] }
  0x55   :  { %708 = vmatpush.bf16.msrb.mxu2 %v1403_v57  ;;  %v1768_v57 = vld [vmem:[#allocation8 + $0x84] sm:$0xf] }
  0x57   :  { %481 = vmatpush.bf16.msrb.mxu0 %v1271_v29  ;;  %v1487_v29 = vor.u32 %v1776_v27, %v1484_v28  ;;  %v1799_v27 = vld [vmem:[#allocation10 + $0x74] sm:$0xf0] }
  0x58   :  { %494 = vmatpush.bf16.msrb.mxu1 %v1335_v30  ;;  %v1474_v30 = vld [vmem:[#allocation8 + $0xb0] sm:$0xf] }
  0x59   :  { %709 = vmatpush.bf16.msrb.mxu2 %v1395_v3  ;;  %v1475_v34 = vor.u32 %v1775_v31, %v1474_v30  ;;  %v1798_v30 = vld [vmem:[#allocation10 + $0x74] sm:$0xf]  ;;  %v1572_v31 = vld [vmem:[#allocation10 + $0x78] sm:$0xf0] }
  0x5a   :  { %v1575_v32 = vor.u32 %v1798_v30, %v1572_v31  ;;  %v1801_v30 = vld [vmem:[#allocation10 + $0x84] sm:$0xf0]  ;;  %v1800_v31 = vld [vmem:[#allocation10 + $0x84] sm:$0xf] }
  0x5b   :  { %482 = vmatpush.bf16.msrb.mxu0 %v1263_v37  ;;  %v1773_v37 = vld [vmem:[#allocation8 + $0xa4] sm:$0xf0] }
  0x5c   :  { %495 = vmatpush.bf16.msrb.mxu1 %v1327_v38  ;;  %v1772_v38 = vld [vmem:[#allocation8 + $0xa4] sm:$0xf]  ;;  %v1467_v40 = vor.u32 %v1773_v37, %v1466_v36  ;;  %v1620_v37 = vld [vmem:[#allocation10 + $0xd8] sm:$0xf0] }
  0x5d   :  { %710 = vmatpush.bf16.msrb.mxu2 %v1387_v15 }
  0x5e   :  { %483 = vmatmul.bf16.vlgmr.msrb.gmra.mxu0 %v2110_v43  ;;  %v1506_v43 = vld [vmem:[#allocation8 + $0xf0] sm:$0xf] }
  0x5f   :  { %729 = vmatpush.bf16.msra.mxu0 %v1447_v39  ;;  %496 = vmatmul.bf16.vlgmr.msrb.gmra.mxu1 %v2112_v47  ;;  %v1782_v47 = vld [vmem:[#allocation8 + $0xf4] sm:$0xf]  ;;  %v1507_v61 = vor.u32 %v1783_v60, %v1506_v43  ;;  %v1468_v39 = vld [vmem:[#allocation8 + $0xa8] sm:$0xf0] }
  0x60   :  { %v1511_v63 = vor.u32 %v1782_v47, %v1508_v62  ;;  %v1634_v47 = vld [vmem:[#allocation10 + $0xf0] sm:$0xf]  ;;  %v1814_v62 = vld [vmem:[#allocation10 + $0xf4] sm:$0xf] }
  0x61   :  { %716 = vmatpush.bf16.msrb.mxu3 %v1507_v61  ;;  %v1815_v61 = vld [vmem:[#allocation10 + $0xf4] sm:$0xf0]  ;;  %v1639_v3 = vor.u32 %v1814_v62, %v1636_v0  ;;  %v1546_v62 = vld [vmem:[#allocation10 + $0x40] sm:$0xf] }
  0x62   :  { %742 = vmatpush.bf16.msra.mxu1 %v1511_v63  ;;  %v1635_v63 = vor.u32 %v1815_v61, %v1634_v47  ;;  %v1604_v61 = vld [vmem:[#allocation10 + $0xb8] sm:$0xf0] }
  0x63   :  { %730 = vmatpush.bf16.msra.mxu0 %v1439_v42  ;;  %v1471_v42 = vor.u32 %v1772_v38, %v1468_v39  ;;  %v1562_v39 = vld [vmem:[#allocation10 + $0x60] sm:$0xf] }
  0x65   :  { %717 = vmatpush.bf16.msrb.mxu3 %v1499_v9 }
  0x66   :  { %743 = vmatpush.bf16.msra.mxu1 %v1503_v11  ;;  %v180_v11 = vperm.slane %v177_v41, 1  ;;  %v1796_v41 = vld [vmem:[#allocation10 + $0x64] sm:$0xf] }
  0x67   :  { %731 = vmatpush.bf16.msra.mxu0 %v1431_v46  ;;  %v1771_v46 = vld [vmem:[#allocation8 + $0x94] sm:$0xf0] }
  0x68   :  { %v1459_v49 = vor.u32 %v1771_v46, %v1458_v45  ;;  %v1610_v45 = vld [vmem:[#allocation10 + $0xc0] sm:$0xf]  ;;  %v1809_v46 = vld [vmem:[#allocation10 + $0xc4] sm:$0xf0] }
  0x69   :  { %718 = vmatpush.bf16.msrb.mxu3 %v1491_v21  ;;  %v1626_v21 = vld [vmem:[#allocation10 + $0xe0] sm:$0xf] }
  0x6a   :  { %744 = vmatpush.bf16.msra.mxu1 %v1495_v23  ;;  %v1812_v23 = vld [vmem:[#allocation10 + $0xe4] sm:$0xf]  ;;  %v1627_v24 = vor.u32 %v1813_v22, %v1626_v21  ;;  %v1588_v21 = vld [vmem:[#allocation10 + $0x98] sm:$0xf0] }
  0x6b   :  { %732 = vmatpush.bf16.msra.mxu0 %v1423_v50  ;;  %v1460_v50 = vld [vmem:[#allocation8 + $0x98] sm:$0xf0]  ;;  %v1631_v28 = vor.u32 %v1812_v23, %v1628_v25  ;;  %v1530_v23 = vld [vmem:[#allocation10 + $0x20] sm:$0xf]  ;;  %v1788_v25 = vld [vmem:[#allocation10 + $0x24] sm:$0xf] }
  0x6c   :  { %v1463_v51 = vor.u32 %v1770_v48, %v1460_v50  ;;  %v1808_v50 = vld [vmem:[#allocation10 + $0xc4] sm:$0xf] }
  0x6d   :  { %719 = vmatpush.bf16.msrb.mxu3 %v1483_v26  ;;  %v1570_v26 = vld [vmem:[#allocation10 + $0x70] sm:$0xf] }
  0x6e   :  { %745 = vmatpush.bf16.msra.mxu1 %v1487_v29  ;;  %v1571_v29 = vor.u32 %v1799_v27, %v1570_v26  ;;  %v1532_v27 = vld [vmem:[#allocation10 + $0x28] sm:$0xf0] }
  0x6f   :  { %733 = vmatpush.bf16.msra.mxu0 %v1415_v53 }
  0x70   :  { %957 = vmatpush.bf16.msra.mxu2 %v1571_v29  ;;  %v1578_v29 = vld [vmem:[#allocation10 + $0x80] sm:$0xf] }
  0x71   :  { %720 = vmatpush.bf16.msrb.mxu3 %v1475_v34  ;;  %v1811_v34 = vld [vmem:[#allocation10 + $0xd4] sm:$0xf0] }
  0x72   :  { %746 = vmatpush.bf16.msra.mxu1 %v1479_v35  ;;  %v1810_v35 = vld [vmem:[#allocation10 + $0xd4] sm:$0xf]  ;;  %v1619_v36 = vor.u32 %v1811_v34, %v1618_v33  ;;  %v1580_v33 = vld [vmem:[#allocation10 + $0x88] sm:$0xf0] }
  0x73   :  { %734 = vmatpush.bf16.msra.mxu0 %v1407_v59  ;;  %v1452_v59 = vld [vmem:[#allocation8 + $0x88] sm:$0xf0]  ;;  %v1623_v38 = vor.u32 %v1810_v35, %v1620_v37  ;;  %v1583_v34 = vor.u32 %v1800_v31, %v1580_v33  ;;  %v1522_v35 = vld [vmem:[#allocation10 + $0x10] sm:$0xf]  ;;  %v1786_v37 = vld [vmem:[#allocation10 + $0x14] sm:$0xf] }
  0x74   :  { %v1455_v43 = vor.u32 %v1768_v57, %v1452_v59  ;;  %v1602_v59 = vld [vmem:[#allocation10 + $0xb0] sm:$0xf] }
  0x75   :  { %721 = vmatpush.bf16.msrb.mxu3 %v1467_v40  ;;  %v1797_v40 = vld [vmem:[#allocation10 + $0x64] sm:$0xf0] }
  0x76   :  { %747 = vmatpush.bf16.msra.mxu1 %v1471_v42  ;;  %v1563_v42 = vor.u32 %v1797_v40, %v1562_v39  ;;  %v1524_v39 = vld [vmem:[#allocation10 + $0x18] sm:$0xf0] }
  0x77   :  { %735 = vmatpush.bf16.msra.mxu0 %v1399_v5  ;;  %v1527_v40 = vor.u32 %v1786_v37, %v1524_v39 }
  0x78   :  { %958 = vmatpush.bf16.msra.mxu2 %v1563_v42  ;;  %v1785_v42 = vld [vmem:[#allocation10 + $0x4] sm:$0xf0] }
  0x79   :  { %722 = vmatpush.bf16.msrb.mxu3 %v1459_v49  ;;  %v1611_v49 = vor.u32 %v1809_v46, %v1610_v45 }
  0x7a   :  { %748 = vmatpush.bf16.msra.mxu1 %v1463_v51  ;;  %v1612_v51 = vld [vmem:[#allocation10 + $0xc8] sm:$0xf0] }
  0x7b   :  { %736 = vmatpush.bf16.msra.mxu0 %v1391_v17 }
  0x7d   :  { %723 = vmatpush.bf16.msrb.mxu3 %v1451_v58  ;;  %v1559_v58 = vor.u32 %v1794_v55, %v1556_v56  ;;  %v1829_v56 = vld [vmem:[#allocation11 + $0x68] sm:$0xff] }
  0x7e   :  { %749 = vmatpush.bf16.msra.mxu1 %v1455_v43  ;;  %v1807_v43 = vld [vmem:[#allocation10 + $0xb4] sm:$0xf0] }
  0x7f   :  { %983 = vmatpush.bf16.msrb.mxu0 %v1575_v32  ;;  %v1603_v47 = vor.u32 %v1807_v43, %v1602_v59  ;;  %v1579_v32 = vor.u32 %v1801_v30, %v1578_v29  ;;  %v537_v59 = vld [vmem:[%s2134_s4] sm:$0x3] }
  0x80   :  { %v1828_v43 = vld [vmem:[#allocation11 + $0x60] sm:$0xff] }
  0x81   :  { %970 = vmatpush.bf16.msra.mxu3 %v1635_v63  ;;  %v1793_v63 = vld [vmem:[#allocation10 + $0x44] sm:$0xf0] }
  0x82   :  { %996 = vmatpush.bf16.msrb.mxu1 %v1639_v3  ;;  %v1548_v3 = vld [vmem:[#allocation10 + $0x48] sm:$0xf0] }
  0x85   :  { %971 = vmatpush.bf16.msra.mxu3 %v1627_v24  ;;  %v1789_v24 = vld [vmem:[#allocation10 + $0x24] sm:$0xf0] }
  0x86   :  { %997 = vmatpush.bf16.msrb.mxu1 %v1631_v28  ;;  %v1531_v26 = vor.u32 %v1789_v24, %v1530_v23  ;;  %v1535_v28 = vor.u32 %v1788_v25, %v1532_v27 }
  0x89   :  { %972 = vmatpush.bf16.msra.mxu3 %v1619_v36  ;;  %v1787_v36 = vld [vmem:[#allocation10 + $0x14] sm:$0xf0] }
  0x8a   :  { %998 = vmatpush.bf16.msrb.mxu1 %v1623_v38  ;;  %v1523_v38 = vor.u32 %v1787_v36, %v1522_v35 }
  0x8d   :  { %973 = vmatpush.bf16.msra.mxu3 %v1611_v49 }
  0x91   :  { %974 = vmatpush.bf16.msra.mxu3 %v1603_v47 }
  0xbb   :  { %v432_v52 = vpop.f32.mrf.mxu0 }
  0xbc   :  { %v433_v53 = vadd.f32 %v432_v52, %v179_v44  ;;  %v445_v54 = vpop.f32.mrf.mxu1  ;;  %v1564_v44 = vld [vmem:[#allocation10 + $0x68] sm:$0xf0]  ;;  %v1554_v52 = vld [vmem:[#allocation10 + $0x50] sm:$0xf] }
  0xbd   :  { %v1567_v48 = vor.u32 %v1796_v41, %v1564_v44  ;;  %v1514_v41 = vld [vmem:[#allocation10] sm:$0xf]  ;;  %v1784_v44 = vld [vmem:[#allocation10 + $0x4] sm:$0xf] }
  0xbe   :  { %v446_v60 = vadd.f32 %v445_v54, %v433_v53  ;;  %v1615_v53 = vor.u32 %v1808_v50, %v1612_v51  ;;  %v1795_v54 = vld [vmem:[#allocation10 + $0x54] sm:$0xf0]  ;;  %v1515_v46 = vor.u32 %v1785_v42, %v1514_v41 }
  0xbf   :  { %984 = vmatpush.bf16.msrb.mxu0 %v1567_v48  ;;  %v1555_v57 = vor.u32 %v1795_v54, %v1554_v52  ;;  %v1516_v48 = vld [vmem:[#allocation10 + $0x8] sm:$0xf0]  ;;  %v1831_v50 = vld [vmem:[#allocation11 + $0x78] sm:$0xff]  ;;  %v1822_v54 = vld [vmem:[#allocation11 + $0x30] sm:$0xff] }
  0xc0   :  { %999 = vmatpush.bf16.msrb.mxu1 %v1615_v53  ;;  %v1519_v49 = vor.u32 %v1784_v44, %v1516_v48  ;;  %v1823_v51 = vld [vmem:[#allocation11 + $0x38] sm:$0xff]  ;;  %v1830_v53 = vld [vmem:[#allocation11 + $0x70] sm:$0xff] }
  0xc1   :  { %959 = vmatpush.bf16.msra.mxu2 %v1555_v57  ;;  %v1821_v57 = vld [vmem:[#allocation11 + $0x28] sm:$0xff] }
  0xc3   :  { %v458_v1 = vpop.f32.mrf.mxu2  ;;  %v434_v2 = vpop.f32.mrf.mxu0  ;;  %985 = vmatpush.bf16.msrb.mxu0 %v1559_v58 }
  0xc4   :  { %v459_v4 = vadd.f32 %v458_v1, %v446_v60  ;;  %v447_v5 = vpop.f32.mrf.mxu1  ;;  %v1806_v60 = vld [vmem:[#allocation10 + $0xb4] sm:$0xf]  ;;  %v1547_v1 = vor.u32 %v1793_v63, %v1546_v62  ;;  %v1792_v2 = vld [vmem:[#allocation10 + $0x44] sm:$0xf]  ;;  %v539_v62 = vperm.slane %v537_v59, 0 }
  0xc5   :  { %v1607_v0 = vor.u32 %v1806_v60, %v1604_v61  ;;  %v1551_v5 = vor.u32 %v1792_v2, %v1548_v3  ;;  %v540_v60 = vperm.slane %v537_v59, 1 }
  0xc6   :  { %v501_v6 = vmax.f32 %v459_v4, 0.0  ;;  %v1594_v4 = vld [vmem:[#allocation10 + $0xa0] sm:$0xf]  ;;  %960 = vmatpush.bf16.msra.mxu2 %v1547_v1 }
  0xc7   :  { %v471_v8 = vpop.f32.mrf.mxu3  ;;  %1000 = vmatpush.bf16.msrb.mxu1 %v1607_v0  ;;  %986 = vmatpush.bf16.msrb.mxu0 %v1551_v5 }
  0xc8   :  { %v503_v7 = vpack.c.bf16 %v501_v6, %v501_v6  ;;  %v472_v12 = vadd.f32 %v471_v8, %v180_v11  ;;  %v1805_v6 = vld [vmem:[#allocation10 + $0xa4] sm:$0xf0]  ;;  %v1596_v8 = vld [vmem:[#allocation10 + $0xa8] sm:$0xf0]  ;;  %v1538_v11 = vld [vmem:[#allocation10 + $0x30] sm:$0xf] }
  0xca   :  { %711 = vmatmul.bf16.vlgmr.msrb.gmra.mxu2 %v503_v7  ;;  %737 = vmatmul.bf16.vlgmr.msra.gmra.mxu0 %v503_v7  ;;  %v1804_v7 = vld [vmem:[#allocation10 + $0xa4] sm:$0xf] }
  0xcb   :  { %v460_v9 = vpop.f32.mrf.mxu2 }
  0xcc   :  { %v1595_v9 = vor.u32 %v1805_v6, %v1594_v4 }
  0xce   :  { %975 = vmatpush.bf16.msra.mxu3 %v1595_v9  ;;  %v1827_v9 = vld [vmem:[#allocation11 + $0x58] sm:$0xff] }
  0xcf   :  { %v473_v10 = vpop.f32.mrf.mxu3 }
  0xd0   :  { %v1599_v10 = vor.u32 %v1804_v7, %v1596_v8 }
  0xd2   :  { %1001 = vmatpush.bf16.msrb.mxu1 %v1599_v10  ;;  %v1820_v10 = vld [vmem:[#allocation11 + $0x20] sm:$0xff] }
  0xdb   :  { %v484_v13 = vpop.f32.mrf.mxu0 }
  0xdc   :  { %v485_v14 = vadd.f32 %v484_v13, %v472_v12  ;;  %v497_v15 = vpop.f32.mrf.mxu1  ;;  %v1791_v12 = vld [vmem:[#allocation10 + $0x34] sm:$0xf0]  ;;  %v1790_v13 = vld [vmem:[#allocation10 + $0x34] sm:$0xf] }
  0xde   :  { %v498_v16 = vadd.f32 %v497_v15, %v485_v14  ;;  %v1539_v14 = vor.u32 %v1791_v12, %v1538_v11  ;;  %v1540_v15 = vld [vmem:[#allocation10 + $0x38] sm:$0xf0]  ;;  %v1826_v11 = vld [vmem:[#allocation11 + $0x50] sm:$0xff] }
  0xdf   :  { %v1819_v12 = vld [vmem:[#allocation11 + $0x18] sm:$0xff] }
  0xe0   :  { %v502_v17 = vmax.f32 %v498_v16, 0.0  ;;  %v1543_v16 = vor.u32 %v1790_v13, %v1540_v15  ;;  %961 = vmatpush.bf16.msra.mxu2 %v1539_v14  ;;  %v1825_v13 = vld [vmem:[#allocation11 + $0x48] sm:$0xff]  ;;  %v1818_v14 = vld [vmem:[#allocation11 + $0x10] sm:$0xff]  ;;  %v1824_v15 = vld [vmem:[#allocation11 + $0x40] sm:$0xff] }
  0xe2   :  { %v504_v18 = vpack.c.bf16 %v502_v17, %v502_v17  ;;  %v1586_v17 = vld [vmem:[#allocation10 + $0x90] sm:$0xf]  ;;  %987 = vmatpush.bf16.msrb.mxu0 %v1543_v16  ;;  %v1817_v16 = vld [vmem:[#allocation11 + $0x8] sm:$0xff] }
  0xe3   :  { %v486_v19 = vpop.f32.mrf.mxu0 }
  0xe4   :  { %v499_v20 = vpop.f32.mrf.mxu1  ;;  %724 = vmatmul.bf16.vlgmr.msrb.gmra.mxu3 %v504_v18  ;;  %750 = vmatmul.bf16.vlgmr.msra.gmra.mxu1 %v504_v18  ;;  %v1803_v18 = vld [vmem:[#allocation10 + $0x94] sm:$0xf0]  ;;  %v1802_v19 = vld [vmem:[#allocation10 + $0x94] sm:$0xf] }
  0xe5   :  { %v1587_v20 = vor.u32 %v1803_v18, %v1586_v17  ;;  %v1591_v22 = vor.u32 %v1802_v19, %v1588_v21  ;;  %962 = vmatpush.bf16.msra.mxu2 %v1531_v26  ;;  %v1816_v17 = vld [vmem:[#allocation11] sm:$0xff] }
  0xe6   :  { %988 = vmatpush.bf16.msrb.mxu0 %v1535_v28  ;;  %v791_v19 = vld [vmem:[%s2136_s6] sm:$0x3] }
  0xe7   :  { %976 = vmatpush.bf16.msra.mxu3 %v1587_v20  ;;  %1002 = vmatpush.bf16.msrb.mxu1 %v1591_v22  ;;  %v794_v20 = vperm.slane %v791_v19, 1  ;;  %v793_v26 = vperm.slane %v791_v19, 0 }
  0xe9   :  { %963 = vmatpush.bf16.msra.mxu2 %v1523_v38  ;;  %v1843_v38 = vld [vmem:[%s2138_s8] ss:$0 sm:$0xff] }
  0xea   :  { %989 = vmatpush.bf16.msrb.mxu0 %v1527_v40 }
  0xeb   :  { %977 = vmatpush.bf16.msra.mxu3 %v1579_v32  ;;  %1003 = vmatpush.bf16.msrb.mxu1 %v1583_v34 }
  0xed   :  { %964 = vmatpush.bf16.msra.mxu2 %v1515_v46 }
  0xee   :  { %990 = vmatpush.bf16.msrb.mxu0 %v1519_v49 }
  0xef   :  { %1158 = vmatpush.bf16.msrb.mxu3 %v1831_v50 }
  0xf1   :  { %1145 = vmatpush.bf16.msrb.mxu2 %v1823_v51 }
  0xf3   :  { %1159 = vmatpush.bf16.msrb.mxu3 %v1830_v53 }
  0xf5   :  { %1146 = vmatpush.bf16.msrb.mxu2 %v1822_v54 }
  0xf7   :  { %1160 = vmatpush.bf16.msrb.mxu3 %v1829_v56 }
  0xf9   :  { %1147 = vmatpush.bf16.msrb.mxu2 %v1821_v57 }
  0xfb   :  { %1161 = vmatpush.bf16.msrb.mxu3 %v1828_v43 }
  0xfd   :  { %1148 = vmatpush.bf16.msrb.mxu2 %v1820_v10 }
  0xff   :  { %1162 = vmatpush.bf16.msrb.mxu3 %v1827_v9 }
 0x101   :  { %1149 = vmatpush.bf16.msrb.mxu2 %v1819_v12 }
 0x103   :  { %1163 = vmatpush.bf16.msrb.mxu3 %v1826_v11 }
 0x105   :  { %1150 = vmatpush.bf16.msrb.mxu2 %v1818_v14 }
 0x107   :  { %1164 = vmatpush.bf16.msrb.mxu3 %v1825_v13 }
 0x109   :  { %1151 = vmatpush.bf16.msrb.mxu2 %v1817_v16 }
 0x10b   :  { %1165 = vmatpush.bf16.msrb.mxu3 %v1824_v15 }
 0x10d   :  { %1152 = vmatpush.bf16.msrb.mxu2 %v1816_v17 }
 0x147   :  { %v738_v45 = vpop.f32.mrf.mxu0 }
 0x148   :  { %v739_v47 = vadd.f32 %v738_v45, %v540_v60 }
 0x14d   :  { %v712_v52 = vpop.f32.mrf.mxu2 }
 0x14e   :  { %v713_v1 = vadd.f32 %v712_v52, %v539_v62 }
 0x14f   :  { %v740_v55 = vpop.f32.mrf.mxu0 }
 0x155   :  { %v714_v58 = vpop.f32.mrf.mxu2 }
 0x161   :  { %v751_v61 = vpop.f32.mrf.mxu1 }
 0x162   :  { %v752_v63 = vadd.f32 %v751_v61, %v739_v47 }
 0x164   :  { %v756_v0 = vmax.f32 %v752_v63, 0.0 }
 0x166   :  { %v758_v2 = vpack.c.bf16 %v756_v0, %v756_v0 }
 0x167   :  { %v725_v3 = vpop.f32.mrf.mxu3 }
 0x168   :  { %v726_v4 = vadd.f32 %v725_v3, %v713_v1  ;;  %978 = vmatmul.bf16.vlgmr.msra.gmra.mxu3 %v758_v2  ;;  %1004 = vmatmul.bf16.vlgmr.msrb.gmra.mxu1 %v758_v2 }
 0x169   :  { %v753_v5 = vpop.f32.mrf.mxu1 }
 0x16a   :  { %v755_v6 = vmax.f32 %v726_v4, 0.0 }
 0x16c   :  { %v757_v7 = vpack.c.bf16 %v755_v6, %v755_v6 }
 0x16e   :  { %965 = vmatmul.bf16.vlgmr.msra.gmra.mxu2 %v757_v7  ;;  %991 = vmatmul.bf16.vlgmr.msrb.gmra.mxu0 %v757_v7 }
 0x16f   :  { %v727_v8 = vpop.f32.mrf.mxu3 }
 0x1e5   :  { %v1005_v18 = vpop.f32.mrf.mxu1 }
 0x1eb   :  { %v979_v21 = vpop.f32.mrf.mxu3  ;;  %v992_v22 = vpop.f32.mrf.mxu0 }
 0x1ec   :  { %v993_v23 = vadd.f32 %v992_v22, %v794_v20 }
 0x1ed   :  { %v1007_v24 = vpop.f32.mrf.mxu1 }
 0x1ee   :  { %v1006_v25 = vadd.f32 %v1005_v18, %v993_v23 }
 0x1f0   :  { %v1010_v27 = vmax.f32 %v1006_v25, 0.0 }
 0x1f1   :  { %v966_v28 = vpop.f32.mrf.mxu2 }
 0x1f2   :  { %v1012_v29 = vpack.c.bf16 %v1010_v27, %v1010_v27  ;;  %v967_v30 = vadd.f32 %v966_v28, %v793_v26 }
 0x1f3   :  { %v981_v31 = vpop.f32.mrf.mxu3  ;;  %v994_v32 = vpop.f32.mrf.mxu0 }
 0x1f4   :  { %v980_v33 = vadd.f32 %v979_v21, %v967_v30  ;;  %1166 = vmatmul.bf16.vlgmr.msrb.gmra.mxu3 %v1012_v29 }
 0x1f6   :  { %v1009_v34 = vmax.f32 %v980_v33, 0.0 }
 0x1f8   :  { %v1011_v35 = vpack.c.bf16 %v1009_v34, %v1009_v34 }
 0x1f9   :  { %v968_v36 = vpop.f32.mrf.mxu2 }
 0x1fa   :  { %1153 = vmatmul.bf16.vlgmr.msrb.gmra.mxu2 %v1011_v35 }
 0x277   :  { %v1167_v37 = vpop.f32.mrf.mxu3 }
 0x27d   :  { %v1154_v39 = vpop.f32.mrf.mxu2 }
 0x27e   :  { %v1155_v40 = vadd.f32 %v1843_v38, %v1154_v39 }
 0x27f   :  { %v1169_v41 = vpop.f32.mrf.mxu3 }
 0x280   :  { %v1168_v42 = vadd.f32 %v1167_v37, %v1155_v40 }
 0x282   :  { %1171 = vst [vmem:[#allocation13] sm:$0xff] %v1168_v42 }
 0x283   :  { %1182 = dma.vmem_to_hbm [thread:$0]  %s1178_s21, 128, %s1180_s3, [#allocation4]  }
 0x285   :  { %v1156_v44 = vpop.f32.mrf.mxu2 }
 0x286   :  { %2020 = dma.done.wait [#allocation4], 128  }
 0x287   :  { %2021 = vsyncadd [#allocation4], 4294967168 }
 0x288   :  { %1187 = vsyncpa [#allocation3], 1 }
 0x289   :  { %1188 = vsyncpa [#allocation6], 1 }
 0x28a   :  { %1189 = vsyncpa [#allocation9], 1 }
 0x28b   :  { %1190 = vsyncpa [#allocation12], 1 }
 0x28c   :  { %1191 = vsyncpa [#allocation4], 1 }

</bundles_post_ra>
